<compile_context>
chip_gen: v6e
topology: v6e:2x2x1
jax: 0.10.0
libtpu: 0.0.40
codegen_flags: <defaults>
</compile_context>

<pallas_src>
import math
from typing import NamedTuple, Optional

import jax
import jax.numpy as jnp
from jax.experimental import pallas as pl
from jax.experimental.pallas import tpu as pltpu


# --------------------------------------------------------------------------- kernel

def _linear_bias_kernel(x_ref, w_ref, b_ref, o_ref):
    # x: (rows, Kp), w: (Kp, lanes), b: (1, lanes), o: (rows, lanes)
    acc = jnp.dot(
        x_ref[...],
        w_ref[...],
        preferred_element_type=jnp.float32,
        precision=jax.lax.Precision.HIGHEST,  # multi-pass f32 MXU, no bf16 truncation
    )
    o_ref[...] = (acc + b_ref[...]).astype(o_ref.dtype)


# --------------------------------------------------------------------------- params

class WMLinearParams(NamedTuple):
    w_t: jax.Array        # (K, E)  weight.T (for the tiny-batch JAX fallback)
    bias: jax.Array       # (E,)
    w_packed: jax.Array   # (pack*K, pack*E) block-diagonal weight.T
    b_packed: jax.Array   # (1, pack*E) tiled bias
    pack: int
    embedding_dim: int


def _choose_pack(E: int, K: int, *, max_pack: int = 8, target_lanes: int = 512) -> int:
    """Smallest pack making pack*E a multiple of 128, then grow toward target_lanes.

    Capped at max_pack=8: wasted block-diagonal MACs scale with pack and pack~16
    crosses the MXU roofline on v5e (and is borderline on v7x).
    """
    base = 128 // math.gcd(E, 128)
    if base > max_pack:
        # E too awkward (e.g. not a divisor-friendly width): fall back to pack=1.
        # Output then has <128 (or non-multiple-of-128) lanes -> masked stores.
        return 1
    pack = base
    while (pack * 2 <= max_pack
           and pack * 2 * E <= target_lanes
           and pack * 2 * K <= 512):
        pack *= 2
    return pack


def prepare_wm_linear_params(weight, bias, *, max_pack: int = 8) -> WMLinearParams:
    """One-time parameter layout prep (keep outside the hot path).

    weight: (E, K) float32, PyTorch nn.Linear layout.  bias: (E,) float32.
    """
    E, K = weight.shape
    w_t = jnp.asarray(weight, jnp.float32).T          # (K, E)
    b = jnp.asarray(bias, jnp.float32)
    pack = _choose_pack(E, K, max_pack=max_pack)
    if pack > 1:
        # Block-diagonal: diagonal blocks are w_t, so the packed matmul is exactly the
        # per-row linear, just laid out lane-dense (pack rows per 128+-lane output row).
        w_packed = jnp.kron(jnp.eye(pack, dtype=jnp.float32), w_t)   # (pack*K, pack*E)
        b_packed = jnp.tile(b, pack).reshape(1, pack * E)
    else:
        w_packed = w_t
        b_packed = b.reshape(1, E)
    assert w_packed.shape == (pack * K, pack * E)
    assert b_packed.shape == (1, pack * E)
    return WMLinearParams(w_t=w_t, bias=b, w_packed=w_packed, b_packed=b_packed,
                          pack=pack, embedding_dim=E)


# --------------------------------------------------------------------------- wrapper

def wm_linear_encoder(x, params: WMLinearParams, *,
                      block_rows: int = 4096,
                      gridless_max_rows: int = 1024,
                      min_pallas_batch: int = 512,
                      out_dtype: Optional[jnp.dtype] = None):
    """Forward of WMLinearEncoder: y = x @ weight.T + bias -> (B, embedding_dim)."""
    B, K = x.shape
    E = params.embedding_dim
    pack = params.pack
    Kp, lanes = params.w_packed.shape
    assert Kp == pack * K, "x feature dim does not match prepared params"
    assert lanes == pack * E, "packed weight / pack / embedding_dim mismatch"
    out_dtype = jnp.dtype(out_dtype) if out_dtype is not None else x.dtype

    # Tiny batches: launch/glue dominates, XLA fuses this trivially -> skip Pallas.
    if B < min_pallas_batch:
        return (x @ params.w_t + params.bias).astype(out_dtype)

    # Pad B to a multiple of `pack` only when needed; pad rows are bias-only garbage
    # that gets sliced off. When B % pack == 0 the reshape below is a free bitcast.
    rows = pl.cdiv(B, pack)
    b_pad = rows * pack
    if b_pad != B:
        x = jnp.pad(x, ((0, b_pad - B), (0, 0)))
    x_packed = x.reshape(rows, Kp)            # bit-exact row-major re-view

    out_shape = jax.ShapeDtypeStruct((rows, lanes), out_dtype)
    out_itemsize = out_dtype.itemsize
    cost = pl.CostEstimate(
        flops=2 * rows * Kp * lanes,
        transcendentals=0,
        bytes_accessed=(rows * Kp * 4 + rows * lanes * out_itemsize
                        + Kp * lanes * 4 + lanes * 4),
    )

    if rows <= gridless_max_rows:
        # Small batch: single gridless invocation, whole problem VMEM-resident
        # (<= ~2.5 MiB at the default cutoff -> fits every generation's scoped default).
        out = pl.pallas_call(
            _linear_bias_kernel,
            out_shape=out_shape,
            in_specs=[pl.BlockSpec(memory_space=pltpu.MemorySpace.VMEM)] * 3,
            out_specs=pl.BlockSpec(memory_space=pltpu.MemorySpace.VMEM),
            cost_estimate=cost,
        )(x_packed, params.w_packed, params.b_packed)
    else:
        # Large batch: 1-D grid over packed rows, weight/bias fully resident.
        br = max(8, (block_rows // 8) * 8)
        if rows <= br:
            # Guarantee >= 2 grid steps so both v7x TensorCores contribute.
            br = max(8, ((pl.cdiv(rows, 2) + 7) // 8) * 8)
        n_blocks = pl.cdiv(rows, br)

        # VMEM budget: double-buffered x + out blocks, double-buffered (tiny) weight
        # and bias, plus margin. Floor 16 MiB (v5e scoped default), cap 48 MiB (v7x
        # has only 64 MiB physical VMEM per TC).
        x_blk = br * Kp * 4
        o_blk = br * lanes * out_itemsize
        w_bytes = Kp * lanes * 4 + lanes * 4
        vmem_bytes = 2 * (x_blk + o_blk) + 2 * w_bytes + (4 << 20)
        vmem_bytes = min(max(vmem_bytes, 16 << 20), 48 << 20)

        out = pl.pallas_call(
            _linear_bias_kernel,
            out_shape=out_shape,
            grid=(n_blocks,),
            in_specs=[
                pl.BlockSpec((br, Kp), lambda i: (i, 0)),
                pl.BlockSpec((Kp, lanes), lambda i: (0, 0)),
                pl.BlockSpec((1, lanes), lambda i: (0, 0)),
            ],
            out_specs=pl.BlockSpec((br, lanes), lambda i: (i, 0)),
            compiler_params=pltpu.CompilerParams(
                dimension_semantics=("parallel",),
                vmem_limit_bytes=int(vmem_bytes),
            ),
            cost_estimate=cost,
        )(x_packed, params.w_packed, params.b_packed)

    # Bit-exact row-major unpack back to (B, E); slice only if we actually padded.
    out = out.reshape(b_pad, E)
    if b_pad != B:
        out = out[:B]
    return out


# --------------------------------------------------------------------------- demo

if __name__ == "__main__":
    key = jax.random.PRNGKey(0)
    k_x, k_w, k_b = jax.random.split(key, 3)

    n_bits = 8
    embedding_dim = 64

    # nn.Linear-style init: uniform(-1/sqrt(in_features), 1/sqrt(in_features)).
    bound = 1.0 / jnp.sqrt(jnp.float32(n_bits))
    weight = jax.random.uniform(k_w, (embedding_dim, n_bits),
                                minval=-bound, maxval=bound, dtype=jnp.float32)
    bias = jax.random.uniform(k_b, (embedding_dim,),
                              minval=-bound, maxval=bound, dtype=jnp.float32)

    # One-time parameter layout prep (outside the hot path).
    params = prepare_wm_linear_params(weight, bias)

    # 1) Small batch, forced through the gridless Pallas path
    #    (min_pallas_batch=0 disables the plain-JAX tiny-batch fallback for the test).
    batch = 8
    x = jax.random.bernoulli(k_x, 0.5, (batch, n_bits)).astype(jnp.float32)
    out = wm_linear_encoder(x, params, min_pallas_batch=0)
    out = jax.block_until_ready(out)
    ref = x @ weight.T + bias
    assert out.shape == (batch, embedding_dim)
    assert jnp.allclose(out, ref, atol=1e-5, rtol=1e-5)

    # 2) Still-small batch routed through the gridded "parallel" path (2 grid steps)
    #    by lowering the gridless cutoff, to exercise that code path as well.
    batch2 = 128
    x2 = jax.random.bernoulli(k_x, 0.5, (batch2, n_bits)).astype(jnp.float32)
    out2 = wm_linear_encoder(x2, params, min_pallas_batch=0, gridless_max_rows=8)
    out2 = jax.block_until_ready(out2)
    ref2 = x2 @ weight.T + bias
    assert out2.shape == (batch2, embedding_dim)
    assert jnp.allclose(out2, ref2, atol=1e-5, rtol=1e-5)

    print("KERNEL_OK")
</pallas_src>

<mosaic_0001>
module attributes {stable_mosaic.version = 11 : i64} {
  func.func @_linear_bias_kernel(%arg0: memref<1x64xf32, #tpu.memory_space<vmem>>, %arg1: memref<64x512xf32, #tpu.memory_space<vmem>>, %arg2: memref<1x512xf32, #tpu.memory_space<vmem>>, %arg3: memref<1x512xf32, #tpu.memory_space<vmem>>) attributes {dimension_semantics = [], scalar_prefetch = 0 : i64, scratch_operands = 0 : i64, tpu.core_type = #tpu.core_type<tc>} {
    %c0 = arith.constant 0 : index
    %c0_0 = arith.constant 0 : index
    %0 = vector.load %arg0[%c0, %c0_0] : memref<1x64xf32, #tpu.memory_space<vmem>>, vector<1x64xf32>
    %c0_1 = arith.constant 0 : index
    %c0_2 = arith.constant 0 : index
    %1 = vector.load %arg1[%c0_1, %c0_2] : memref<64x512xf32, #tpu.memory_space<vmem>>, vector<64x512xf32>
    %cst = arith.constant dense<0.000000e+00> : vector<1x512xf32>
    %2 = tpu.matmul %0, %1, %cst {dimension_numbers = #tpu.dot_dimension_numbers<[1], [0], [0], [1], [0, 0, 1, 1], [], []>, precision = #tpu.contract_precision<fp32>} : vector<1x64xf32>, vector<64x512xf32>, vector<1x512xf32> -> vector<1x512xf32>
    %c0_3 = arith.constant 0 : index
    %c0_4 = arith.constant 0 : index
    %3 = vector.load %arg2[%c0_3, %c0_4] : memref<1x512xf32, #tpu.memory_space<vmem>>, vector<1x512xf32>
    %4 = arith.addf %2, %3 : vector<1x512xf32>
    %c0_5 = arith.constant 0 : index
    %c0_6 = arith.constant 0 : index
    %5 = vector.load %arg3[%c0_5, %c0_6] : memref<1x512xf32, #tpu.memory_space<vmem>>, vector<1x512xf32>
    tpu.vector_store %arg3[%c0_5, %c0_6], %4 {strides = array<i32>} : memref<1x512xf32, #tpu.memory_space<vmem>>, vector<1x512xf32>,
    return
  }
}

</mosaic_0001>

<bundles_post_ra>
// kernel: tpu_custom_call.1
= control target key start
LH: loop header
LB: loop body
LE: loop exit
PB: predicated region body
PF: predicated region fallthrough
CT: control target
= control target key end

     0   :  { %8 = vsyncpa [#allocation3], 0  ;;  %s2132_s0 = inlined_call_operand.hbm [shape: f32[1,64], index: 0, kind: input, shape index: {}]   ;;  %s2133_s1 = inlined_call_operand.hbm [shape: f32[64,512], index: 1, kind: input, shape index: {}]   ;;  %s2134_s2 = inlined_call_operand.hbm [shape: f32[1,512], index: 2, kind: input, shape index: {}]   ;;  %s2135_s3 = inlined_call_operand.hbm [shape: f32[1,512], index: 3, kind: output, shape index: {}]  }
   0x1   :  { %9 = vsyncpa [#allocation6], 0 }
   0x2   :  { %10 = vsyncpa [#allocation4], 0  ;;  %s1549_s12 = smov [#allocation5]  }
   0x3   :  { %s26_s13 = sshll.u32 %s1549_s12, 4  ;;  %s27_s13 = int_to_ptr.vmem [resolvable:$true] %s26_s13 }
   0x4   :  { %s1471_s14 = scalar_lea.vmem %s27_s13, 4096  ;;  %p1476_p1 = scmp.lt.s32.totalorder %s27_s13, %s27_s13 }
   0x5   :  { %p1472_p0 = scmp.ne.s32.totalorder %s27_s13, %s1471_s14  ;;  %p1477_p2 = scmp.lt.s32.totalorder %s1471_s14, %s1471_s14 }
   0x7   :  { %p1478_p3 = por %p1477_p2, %p1476_p1 }
   0x9   :  { %p1479_p4 = pnand %p1478_p3, %p1472_p0 }
   0xb   :  { %1482 = shalt.err (!%p1479_p4)
}
   0xc   :  { %s1550_s15 = smov 512   ;;  %s1551_s16 = smov 32  }
   0xd   :  { %32 = dma.hbm_to_vmem [thread:$0]  %s2133_s1, 4096, %s27_s13, [#allocation6], %s1550_s15, %s1550_s15, %s1551_s16  }
   0xe   :  { %s1552_s19 = smov [#allocation2]   ;;  %s1553_s21 = smov [#allocation7]  }
   0xf   :  { %s17_s20 = sshll.u32 %s1552_s19, 4  ;;  %s39_s22 = sshll.u32 %s1553_s21, 4  ;;  %s18_s20 = int_to_ptr.vmem [resolvable:$true] %s17_s20  ;;  %s40_s22 = int_to_ptr.vmem [resolvable:$true] %s39_s22 }
  0x10   :  { %s1491_s23 = scalar_lea.vmem %s18_s20, 16  ;;  %s1495_s24 = scalar_lea.vmem %s18_s20, 32 }
  0x11   :  { %p1492_p5 = scmp.ne.s32.totalorder %s18_s20, %s1491_s23  ;;  %p1496_p6 = scmp.lt.s32.totalorder %s18_s20, %s18_s20 }
  0x12   :  { %p1497_p7 = scmp.lt.s32.totalorder %s1495_s24, %s1491_s23 }
  0x14   :  { %p1498_p8 = por %p1497_p7, %p1496_p6 }
  0x16   :  { %p1499_p9 = pnand %p1498_p8, %p1492_p5 }
  0x18   :  { %1502 = shalt.err (!%p1499_p9)
}
  0x19   :  { %20 = dma.hbm_to_vmem [thread:$0]  %s2132_s0, 16, %s18_s20, [#allocation3]  }
  0x1a   :  { %s1511_s27 = scalar_lea.vmem %s40_s22, 64  ;;  %p1516_p11 = scmp.lt.s32.totalorder %s40_s22, %s40_s22 }
  0x1b   :  { %p1512_p10 = scmp.ne.s32.totalorder %s40_s22, %s1511_s27  ;;  %p1517_p12 = scmp.lt.s32.totalorder %s1511_s27, %s1511_s27 }
  0x1d   :  { %p1518_p13 = por %p1517_p12, %p1516_p11 }
  0x1f   :  { %p1519_p0 = pnand %p1518_p13, %p1512_p10 }
  0x21   :  { %1522 = shalt.err (!%p1519_p0)
}
  0x22   :  { %42 = dma.hbm_to_vmem [thread:$0]  %s2134_s2, 64, %s40_s22, [#allocation6]  }
  0x23   :  { %1543 = dma.done.wait [#allocation3], 16  }
  0x24   :  { %1544 = vsyncadd [#allocation3], 4294967280 }
  0x25   :  { %1545 = dma.done.wait [#allocation6], 4160  }
  0x26   :  { %1546 = vsyncadd [#allocation6], 4294963136  ;;  %v1554_v0 = vmov 0.0   ;;  %v82_v1 = vld [vmem:[#allocation5 + $0xe8] sm:$0xff]  ;;  %v81_v2 = vld [vmem:[#allocation5 + $0xe0] sm:$0xff]  ;;  %vm107_vm0 = vcmask 523264  }
  0x27   :  { %191 = vmatprep.mubr.f32.mxu0 %v1554_v0  ;;  %347 = vmatprep.mubr.f32.mxu1 %v1554_v0  ;;  %v78_v3 = vld [vmem:[#allocation5 + $0xc8] sm:$0xff]  ;;  %v1588_v4 = vand.u32 4294901760, %v82_v1  ;;  %v1590_v5 = vand.u32 4294901760, %v81_v2  ;;  %v77_v7 = vld [vmem:[#allocation5 + $0xc0] sm:$0xff]  ;;  %v52_v51 = vld [vmem:[#allocation2] sm:$0x1] }
  0x28   :  { %v1592_v6 = vand.u32 4294901760, %v78_v3  ;;  %v74_v8 = vld [vmem:[#allocation5 + $0xa8] sm:$0xff]  ;;  %v73_v9 = vld [vmem:[#allocation5 + $0xa0] sm:$0xff]  ;;  %v1594_v10 = vand.u32 4294901760, %v77_v7  ;;  %v109_v62 = vsel %vm107_vm0, %v52_v51, 0  ;;  %s1556_s0 = smov [#allocation8]  }
  0x29   :  { %v1596_v11 = vand.u32 4294901760, %v74_v8  ;;  %v1598_v12 = vand.u32 4294901760, %v73_v9  ;;  %v70_v13 = vld [vmem:[#allocation5 + $0x88] sm:$0xff]  ;;  %v69_v14 = vld [vmem:[#allocation5 + $0x80] sm:$0xff]  ;;  %128 = vmatprep.subr.mxu0 %v1588_v4  ;;  %v1608_v19 = vsub.f32 %v82_v1, %v1588_v4  ;;  %v1618_v24 = vsub.f32 %v81_v2, %v1590_v5  ;;  %s1445_s2 = sshll.u32 %s1556_s0, 4  ;;  %s1446_s2 = int_to_ptr.vmem [resolvable:$true] %s1445_s2 }
  0x2a   :  { %v66_v15 = vld [vmem:[#allocation5 + $0x68] sm:$0xff]  ;;  %v1601_v16 = vand.u32 4294901760, %v70_v13  ;;  %v1603_v17 = vand.u32 4294901760, %v69_v14  ;;  %v65_v20 = vld [vmem:[#allocation5 + $0x60] sm:$0xff]  ;;  %130 = vmatpush1.msra.mxu0 %v1590_v5  ;;  %v1624_v26 = vsub.f32 %v78_v3, %v1592_v6  ;;  %v1638_v32 = vsub.f32 %v77_v7, %v1594_v10  ;;  %s1523_s29 = scalar_lea.vmem %s1446_s2, 64  ;;  %p1528_p2 = scmp.lt.s32.totalorder %s1446_s2, %s1446_s2 }
  0x2b   :  { %v1605_v18 = vand.u32 4294901760, %v66_v15  ;;  %v1610_v21 = vld [vmem:[#allocation5 + $0x48] sm:$0xff]  ;;  %v1612_v22 = vld [vmem:[#allocation5 + $0x40] sm:$0xff]  ;;  %v1615_v23 = vand.u32 4294901760, %v65_v20  ;;  %132 = vmatprep.subr.mxu0 %v1592_v6  ;;  %v221_v30 = vand.u32 4294901760, %v1608_v19  ;;  %v227_v34 = vand.u32 4294901760, %v1618_v24  ;;  %p1524_p1 = scmp.ne.s32.totalorder %s1446_s2, %s1523_s29  ;;  %p1529_p3 = scmp.lt.s32.totalorder %s1523_s29, %s1523_s29 }
  0x2c   :  { %v1621_v25 = vand.u32 4294901760, %v1610_v21  ;;  %v1626_v27 = vld [vmem:[#allocation5 + $0x28] sm:$0xff]  ;;  %v1628_v28 = vld [vmem:[#allocation5 + $0x20] sm:$0xff]  ;;  %v1635_v31 = vand.u32 4294901760, %v1612_v22  ;;  %134 = vmatpush1.msra.mxu0 %v1594_v10  ;;  %v233_v35 = vand.u32 4294901760, %v1624_v26  ;;  %v1647_v36 = vsub.f32 %v74_v8, %v1596_v11 }
  0x2d   :  { %v1630_v29 = vld [vmem:[#allocation5 + $0x8] sm:$0xff]  ;;  %v1641_v33 = vand.u32 4294901760, %v1626_v27  ;;  %v1650_v37 = vand.u32 4294901760, %v1628_v28  ;;  %v1652_v38 = vld [vmem:[#allocation5] sm:$0xff]  ;;  %136 = vmatprep.subr.mxu0 %v1596_v11  ;;  %v222_v39 = vsub.f32 %v1608_v19, %v221_v30  ;;  %v239_v40 = vand.u32 4294901760, %v1638_v32  ;;  %p1530_p4 = por %p1529_p3, %p1528_p2 }
  0x2e   :  { %v1660_v41 = vsub.f32 %v73_v9, %v1598_v12  ;;  %v1663_v42 = vand.u32 4294901760, %v1630_v29  ;;  %138 = vmatpush1.msra.mxu0 %v1598_v12  ;;  %v228_v43 = vsub.f32 %v1618_v24, %v227_v34  ;;  %v234_v44 = vsub.f32 %v1624_v26, %v233_v35 }
  0x2f   :  { %v245_v45 = vand.u32 4294901760, %v1647_v36  ;;  %v1674_v46 = vsub.f32 %v70_v13, %v1601_v16  ;;  %140 = vmatprep.subr.mxu0 %v1601_v16  ;;  %v223_v47 = vand.u32 4294901760, %v222_v39  ;;  %v240_v48 = vsub.f32 %v1638_v32, %v239_v40  ;;  %p1531_p5 = pnand %p1530_p4, %p1524_p1 }
  0x30   :  { %v251_v49 = vand.u32 4294901760, %v1660_v41  ;;  %v1682_v50 = vand.u32 4294901760, %v1652_v38  ;;  %142 = vmatpush1.msra.mxu0 %v1603_v17  ;;  %v229_v52 = vand.u32 4294901760, %v228_v43  ;;  %v235_v53 = vand.u32 4294901760, %v234_v44 }
  0x31   :  { %v246_v54 = vsub.f32 %v1647_v36, %v245_v45  ;;  %v257_v55 = vand.u32 4294901760, %v1674_v46  ;;  %144 = vmatprep.subr.mxu0 %v1605_v18  ;;  %224 = vmatprep.subr.mxu1 %v223_v47  ;;  %v241_v56 = vand.u32 4294901760, %v240_v48  ;;  %v1694_v58 = vsub.f32 %v69_v14, %v1603_v17 }
  0x32   :  { %v252_v57 = vsub.f32 %v1660_v41, %v251_v49  ;;  %v1697_v59 = vsub.f32 %v66_v15, %v1605_v18  ;;  %146 = vmatpush1.msra.mxu0 %v1615_v23  ;;  %230 = vmatpush1.msra.mxu1 %v229_v52  ;;  %v1705_v63 = vsub.f32 %v65_v20, %v1615_v23  ;;  %v1710_v7 = vand.u32 4294901760, %v109_v62 }
  0x33   :  { %v247_v60 = vand.u32 4294901760, %v246_v54  ;;  %v258_v61 = vsub.f32 %v1674_v46, %v257_v55  ;;  %148 = vmatprep.subr.mxu0 %v1621_v25  ;;  %236 = vmatprep.subr.mxu1 %v235_v53  ;;  %v263_v2 = vand.u32 4294901760, %v1694_v58  ;;  %v1716_v13 = vsub.f32 %v1610_v21, %v1621_v25 }
  0x34   :  { %v253_v1 = vand.u32 4294901760, %v252_v57  ;;  %v269_v3 = vand.u32 4294901760, %v1697_v59  ;;  %150 = vmatpush1.msra.mxu0 %v1635_v31  ;;  %242 = vmatpush1.msra.mxu1 %v241_v56  ;;  %v275_v9 = vand.u32 4294901760, %v1705_v63  ;;  %v1720_v14 = vsub.f32 %v1612_v22, %v1635_v31 }
  0x35   :  { %v259_v8 = vand.u32 4294901760, %v258_v61  ;;  %152 = vmatprep.subr.mxu0 %v1641_v33  ;;  %248 = vmatprep.subr.mxu1 %v247_v60  ;;  %v264_v15 = vsub.f32 %v1694_v58, %v263_v2  ;;  %v1730_v39 = vsub.f32 %v109_v62, %v1710_v7  ;;  %v281_v22 = vand.u32 4294901760, %v1716_v13 }
  0x36   :  { %v270_v20 = vsub.f32 %v1697_v59, %v269_v3  ;;  %154 = vmatpush1.msra.mxu0 %v1650_v37  ;;  %254 = vmatpush1.msra.mxu1 %v253_v1  ;;  %v276_v21 = vsub.f32 %v1705_v63, %v275_v9  ;;  %v287_v43 = vand.u32 4294901760, %v1720_v14  ;;  %v1740_v44 = vsub.f32 %v1626_v27, %v1641_v33 }
  0x37   :  { %156 = vmatprep.subr.mxu0 %v1663_v42  ;;  %260 = vmatprep.subr.mxu1 %v259_v8  ;;  %v265_v47 = vand.u32 4294901760, %v264_v15  ;;  %v1744_v51 = vand.u32 4294901760, %v1730_v39  ;;  %v1748_v52 = vsub.f32 %v1628_v28, %v1650_v37  ;;  %v282_v27 = vsub.f32 %v1716_v13, %v281_v22 }
  0x38   :  { %v271_v48 = vand.u32 4294901760, %v270_v20  ;;  %158 = vmatpush1.msra.mxu0 %v1682_v50  ;;  %v277_v53 = vand.u32 4294901760, %v276_v21  ;;  %v288_v54 = vsub.f32 %v1720_v14, %v287_v43  ;;  %v293_v56 = vand.u32 4294901760, %v1740_v44 }
  0x39   :  { %266 = vmatpush1.msra.mxu1 %v265_v47  ;;  %373 = vmatprep.subr.mxu0 %v1608_v19  ;;  %v195_v28 = vsub.f32 %v1730_v39, %v1744_v51  ;;  %v299_v57 = vand.u32 4294901760, %v1748_v52  ;;  %v1764_v60 = vsub.f32 %v1630_v29, %v1663_v42  ;;  %v1768_v61 = vsub.f32 %v1652_v38, %v1682_v50  ;;  %v84_v19 = vld [vmem:[#allocation5 + $0xf8] sm:$0xff] }
  0x3a   :  { %272 = vmatprep.subr.mxu1 %v271_v48  ;;  %v283_v62 = vand.u32 4294901760, %v282_v27  ;;  %v289_v1 = vand.u32 4294901760, %v288_v54  ;;  %v294_v8 = vsub.f32 %v1740_v44, %v293_v56 }
  0x3b   :  { %v1773_v15 = vand.u32 4294901760, %v195_v28  ;;  %278 = vmatpush1.msra.mxu1 %v277_v53  ;;  %v300_v20 = vsub.f32 %v1748_v52, %v299_v57  ;;  %v305_v29 = vand.u32 4294901760, %v1764_v60  ;;  %v311_v21 = vand.u32 4294901760, %v1768_v61 }
  0x3c   :  { %284 = vmatprep.subr.mxu1 %v283_v62  ;;  %v295_v38 = vand.u32 4294901760, %v294_v8  ;;  %v56_v62 = vld [vmem:[#allocation5 + $0x18] sm:$0xff] }
  0x3d   :  { %197 = vmatmul.mubr.f32.vlgmr.msra.gmra.mxu0 %v1773_v15  ;;  %290 = vmatpush1.msra.mxu1 %v289_v1  ;;  %v301_v47 = vand.u32 4294901760, %v300_v20  ;;  %v306_v48 = vsub.f32 %v1764_v60, %v305_v29  ;;  %v312_v53 = vsub.f32 %v1768_v61, %v311_v21 }
  0x3e   :  { %376 = vmatpush1.msra.mxu0 %v1618_v24  ;;  %296 = vmatprep.subr.mxu1 %v295_v38  ;;  %v83_v24 = vld [vmem:[#allocation5 + $0xf0] sm:$0xff] }
  0x3f   :  { %379 = vmatprep.subr.mxu0 %v1624_v26  ;;  %302 = vmatpush1.msra.mxu1 %v301_v47  ;;  %v307_v27 = vand.u32 4294901760, %v306_v48  ;;  %v313_v54 = vand.u32 4294901760, %v312_v53  ;;  %v80_v26 = vld [vmem:[#allocation5 + $0xd8] sm:$0xff]  ;;  %v1955_v53 = vand.u32 4294901760, %v56_v62 }
  0x40   :  { %382 = vmatpush1.msra.mxu0 %v1638_v32  ;;  %451 = vmatprep.mubr.f32.mxu0 %v1554_v0  ;;  %v79_v32 = vld [vmem:[#allocation5 + $0xd0] sm:$0xff] }
  0x41   :  { %385 = vmatprep.subr.mxu0 %v1647_v36  ;;  %308 = vmatprep.subr.mxu1 %v307_v27  ;;  %v1846_v36 = vand.u32 4294901760, %v80_v26 }
  0x42   :  { %388 = vmatpush1.msra.mxu0 %v1660_v41  ;;  %314 = vmatpush1.msra.mxu1 %v313_v54  ;;  %v1851_v41 = vand.u32 4294901760, %v79_v32 }
  0x43   :  { %391 = vmatprep.subr.mxu0 %v1674_v46  ;;  %349 = vmatmul.mubr.f32.vlgmr.msra.gmra.mxu1 %v1710_v7 }
  0x44   :  { %394 = vmatpush1.msra.mxu0 %v1694_v58  ;;  %477 = vmatprep.subr.mxu1 %v1588_v4  ;;  %v68_v58 = vld [vmem:[#allocation5 + $0x78] sm:$0xff] }
  0x45   :  { %397 = vmatprep.subr.mxu0 %v1697_v59  ;;  %479 = vmatpush1.msra.mxu1 %v1590_v5  ;;  %v67_v59 = vld [vmem:[#allocation5 + $0x70] sm:$0xff] }
  0x46   :  { %400 = vmatpush1.msra.mxu0 %v1705_v63  ;;  %481 = vmatprep.subr.mxu1 %v1592_v6  ;;  %v1875_v63 = vsub.f32 %v80_v26, %v1846_v36 }
  0x47   :  { %403 = vmatprep.subr.mxu0 %v1716_v13  ;;  %483 = vmatpush1.msra.mxu1 %v1594_v10  ;;  %v64_v13 = vld [vmem:[#allocation5 + $0x58] sm:$0xff] }
  0x48   :  { %406 = vmatpush1.msra.mxu0 %v1720_v14  ;;  %485 = vmatprep.subr.mxu1 %v1596_v11 }
  0x49   :  { %409 = vmatprep.subr.mxu0 %v1740_v44  ;;  %487 = vmatpush1.msra.mxu1 %v1598_v12 }
  0x4a   :  { %412 = vmatpush1.msra.mxu0 %v1748_v52  ;;  %489 = vmatprep.subr.mxu1 %v1601_v16  ;;  %v60_v52 = vld [vmem:[#allocation5 + $0x38] sm:$0xff] }
  0x4b   :  { %415 = vmatprep.subr.mxu0 %v1764_v60  ;;  %491 = vmatpush1.msra.mxu1 %v1603_v17  ;;  %v59_v60 = vld [vmem:[#allocation5 + $0x30] sm:$0xff]  ;;  %v1936_v20 = vand.u32 4294901760, %v60_v52 }
  0x4c   :  { %418 = vmatpush1.msra.mxu0 %v1768_v61  ;;  %493 = vmatprep.subr.mxu1 %v1605_v18  ;;  %v1947_v47 = vand.u32 4294901760, %v59_v60 }
  0x4d   :  { %454 = vmatmul.mubr.f32.vlgmr.msra.gmra.mxu0 %v1730_v39  ;;  %569 = vmatprep.subr.mxu0 %v221_v30  ;;  %v1836_v30 = vand.u32 4294901760, %v84_v19 }
  0x4e   :  { %495 = vmatpush1.msra.mxu1 %v1615_v23  ;;  %573 = vmatpush1.msra.mxu0 %v227_v34  ;;  %v1841_v34 = vand.u32 4294901760, %v83_v24 }
  0x4f   :  { %497 = vmatprep.subr.mxu1 %v1621_v25  ;;  %577 = vmatprep.subr.mxu0 %v233_v35  ;;  %v76_v35 = vld [vmem:[#allocation5 + $0xb8] sm:$0xff] }
  0x50   :  { %499 = vmatpush1.msra.mxu1 %v1635_v31  ;;  %581 = vmatpush1.msra.mxu0 %v239_v40  ;;  %v75_v40 = vld [vmem:[#allocation5 + $0xb0] sm:$0xff]  ;;  %v1856_v46 = vand.u32 4294901760, %v76_v35 }
  0x51   :  { %501 = vmatprep.subr.mxu1 %v1641_v33  ;;  %585 = vmatprep.subr.mxu0 %v245_v45  ;;  %v72_v45 = vld [vmem:[#allocation5 + $0x98] sm:$0xff] }
  0x52   :  { %503 = vmatpush1.msra.mxu1 %v1650_v37  ;;  %589 = vmatpush1.msra.mxu0 %v251_v49  ;;  %v71_v49 = vld [vmem:[#allocation5 + $0x90] sm:$0xff]  ;;  %v1892_v14 = vsub.f32 %v76_v35, %v1856_v46  ;;  %v1975_v35 = vsub.f32 %v60_v52, %v1936_v20 }
  0x53   :  { %505 = vmatprep.subr.mxu1 %v1663_v42  ;;  %593 = vmatprep.subr.mxu0 %v257_v55  ;;  %v1867_v55 = vand.u32 4294901760, %v75_v40 }
  0x54   :  { %507 = vmatpush1.msra.mxu1 %v1682_v50  ;;  %540 = vmatprep.mubr.f32.mxu1 %v1554_v0 }
  0x55   :  { %597 = vmatpush1.msra.mxu0 %v263_v2  ;;  %544 = vmatmul.mubr.f32.vlgmr.msra.gmra.mxu1 %v1744_v51  ;;  %v1883_v2 = vand.u32 4294901760, %v71_v49 }
  0x56   :  { %601 = vmatprep.subr.mxu0 %v269_v3  ;;  %687 = vmatprep.subr.mxu1 %v1588_v4  ;;  %v1859_v4 = vsub.f32 %v84_v19, %v1836_v30  ;;  %v63_v3 = vld [vmem:[#allocation5 + $0x50] sm:$0xff] }
  0x57   :  { %605 = vmatpush1.msra.mxu0 %v275_v9  ;;  %689 = vmatpush1.msra.mxu1 %v1590_v5  ;;  %v1865_v5 = vsub.f32 %v83_v24, %v1841_v34  ;;  %v1906_v44 = vand.u32 4294901760, %v63_v3  ;;  %v1914_v28 = vsub.f32 %v71_v49, %v1883_v2 }
  0x58   :  { %609 = vmatprep.subr.mxu0 %v281_v22  ;;  %691 = vmatprep.subr.mxu1 %v1592_v6  ;;  %v1872_v6 = vand.u32 4294901760, %v72_v45  ;;  %v868_v9 = vand.u32 4294901760, %v1859_v4  ;;  %v1900_v22 = vand.u32 4294901760, %v67_v59 }
  0x59   :  { %613 = vmatpush1.msra.mxu0 %v287_v43  ;;  %693 = vmatpush1.msra.mxu1 %v1594_v10  ;;  %v1881_v10 = vsub.f32 %v79_v32, %v1851_v41  ;;  %v880_v43 = vand.u32 4294901760, %v1875_v63  ;;  %v1945_v38 = vsub.f32 %v63_v3, %v1906_v44  ;;  %v910_v27 = vand.u32 4294901760, %v1914_v28 }
  0x5a   :  { %617 = vmatprep.subr.mxu0 %v293_v56  ;;  %695 = vmatprep.subr.mxu1 %v1596_v11  ;;  %v1888_v11 = vand.u32 4294901760, %v68_v58  ;;  %v1909_v56 = vsub.f32 %v72_v45, %v1872_v6  ;;  %v869_v61 = vsub.f32 %v1859_v4, %v868_v9  ;;  %v1931_v8 = vsub.f32 %v67_v59, %v1900_v22 }
  0x5b   :  { %621 = vmatpush1.msra.mxu0 %v299_v57  ;;  %697 = vmatpush1.msra.mxu1 %v1598_v12  ;;  %v1898_v12 = vsub.f32 %v75_v40, %v1867_v55  ;;  %v1916_v57 = vand.u32 4294901760, %v64_v13  ;;  %v1980_v45 = vsub.f32 %v59_v60, %v1947_v47  ;;  %v1993_v3 = vsub.f32 %v56_v62, %v1955_v53 }
  0x5c   :  { %625 = vmatprep.subr.mxu0 %v305_v29  ;;  %699 = vmatprep.subr.mxu1 %v1601_v16  ;;  %v874_v16 = vand.u32 4294901760, %v1865_v5  ;;  %v1926_v1 = vsub.f32 %v68_v58, %v1888_v11  ;;  %v904_v48 = vand.u32 4294901760, %v1909_v56  ;;  %v870_v19 = vand.u32 4294901760, %v869_v61 }
  0x5d   :  { %629 = vmatpush1.msra.mxu0 %v311_v21  ;;  %662 = vmatprep.mubr.f32.mxu0 %v1554_v0  ;;  %v898_v29 = vand.u32 4294901760, %v1898_v12  ;;  %v55_v21 = vld [vmem:[#allocation5 + $0x10] sm:$0xff]  ;;  %v1959_v54 = vsub.f32 %v64_v13, %v1916_v57  ;;  %v922_v49 = vand.u32 4294901760, %v1931_v8  ;;  %v934_v61 = vand.u32 4294901760, %v1945_v38 }
  0x5e   :  { %701 = vmatpush1.msra.mxu1 %v1603_v17  ;;  %664 = vmatmul.mubr.f32.vlgmr.msra.gmra.mxu0 %v1710_v7  ;;  %v886_v17 = vand.u32 4294901760, %v1881_v10  ;;  %v1966_v24 = vand.u32 4294901760, %v55_v21  ;;  %v916_v26 = vand.u32 4294901760, %v1926_v1  ;;  %v2136_v62 = vand.u32 4294901760, %v1975_v35 }
  0x5f   :  { %703 = vmatprep.subr.mxu1 %v1605_v18  ;;  %775 = vmatprep.subr.mxu0 %v1836_v30  ;;  %v892_v18 = vand.u32 4294901760, %v1892_v14  ;;  %v928_v59 = vand.u32 4294901760, %v1959_v54 }
  0x60   :  { %705 = vmatpush1.msra.mxu1 %v1615_v23  ;;  %777 = vmatpush1.msra.mxu0 %v1841_v34  ;;  %v875_v23 = vsub.f32 %v1865_v5, %v874_v16  ;;  %v1997_v52 = vsub.f32 %v55_v21, %v1966_v24  ;;  %v917_v60 = vsub.f32 %v1926_v1, %v916_v26 }
  0x61   :  { %707 = vmatprep.subr.mxu1 %v1621_v25  ;;  %779 = vmatprep.subr.mxu0 %v1846_v36  ;;  %v881_v25 = vsub.f32 %v1875_v63, %v880_v43  ;;  %v923_v21 = vsub.f32 %v1931_v8, %v922_v49 }
  0x62   :  { %709 = vmatpush1.msra.mxu1 %v1635_v31  ;;  %781 = vmatpush1.msra.mxu0 %v1851_v41  ;;  %v887_v31 = vsub.f32 %v1881_v10, %v886_v17  ;;  %v876_v32 = vand.u32 4294901760, %v875_v23 }
  0x63   :  { %711 = vmatprep.subr.mxu1 %v1641_v33  ;;  %783 = vmatprep.subr.mxu0 %v1856_v46  ;;  %v893_v33 = vsub.f32 %v1892_v14, %v892_v18  ;;  %v882_v40 = vand.u32 4294901760, %v881_v25 }
  0x64   :  { %713 = vmatpush1.msra.mxu1 %v1650_v37  ;;  %785 = vmatpush1.msra.mxu0 %v1867_v55  ;;  %v899_v37 = vsub.f32 %v1898_v12, %v898_v29  ;;  %v888_v58 = vand.u32 4294901760, %v887_v31  ;;  %v946_v31 = vand.u32 4294901760, %v1980_v45 }
  0x65   :  { %715 = vmatprep.subr.mxu1 %v1663_v42  ;;  %787 = vmatprep.subr.mxu0 %v1872_v6  ;;  %v905_v42 = vsub.f32 %v1909_v56, %v904_v48  ;;  %v894_v13 = vand.u32 4294901760, %v893_v33  ;;  %v929_v33 = vsub.f32 %v1959_v54, %v928_v59 }
  0x66   :  { %717 = vmatpush1.msra.mxu1 %v1682_v50  ;;  %750 = vmatprep.mubr.f32.mxu1 %v1554_v0  ;;  %v911_v50 = vsub.f32 %v1914_v28, %v910_v27  ;;  %v900_v23 = vand.u32 4294901760, %v899_v37  ;;  %v918_v37 = vand.u32 4294901760, %v917_v60 }
  0x67   :  { %789 = vmatpush1.msra.mxu0 %v1883_v2  ;;  %752 = vmatmul.mubr.f32.vlgmr.msra.gmra.mxu1 %v1710_v7  ;;  %v906_v25 = vand.u32 4294901760, %v905_v42  ;;  %v958_v42 = vand.u32 4294901760, %v1997_v52  ;;  %v930_v60 = vand.u32 4294901760, %v929_v33 }
  0x68   :  { %791 = vmatprep.subr.mxu0 %v1888_v11  ;;  %871 = vmatprep.subr.mxu1 %v870_v19  ;;  %v912_v19 = vand.u32 4294901760, %v911_v50  ;;  %v924_v50 = vand.u32 4294901760, %v923_v21 }
  0x69   :  { %793 = vmatpush1.msra.mxu0 %v1900_v22  ;;  %877 = vmatpush1.msra.mxu1 %v876_v32  ;;  %v952_v32 = vand.u32 4294901760, %v1993_v3 }
  0x6a   :  { %795 = vmatprep.subr.mxu0 %v1916_v57  ;;  %883 = vmatprep.subr.mxu1 %v882_v40  ;;  %v935_v40 = vsub.f32 %v1945_v38, %v934_v61 }
  0x6b   :  { %797 = vmatpush1.msra.mxu0 %v1906_v44  ;;  %889 = vmatpush1.msra.mxu1 %v888_v58  ;;  %v941_v58 = vsub.f32 %v1975_v35, %v2136_v62 }
  0x6c   :  { %799 = vmatprep.subr.mxu0 %v1936_v20  ;;  %895 = vmatprep.subr.mxu1 %v894_v13  ;;  %v947_v13 = vsub.f32 %v1980_v45, %v946_v31  ;;  %v936_v62 = vand.u32 4294901760, %v935_v40 }
  0x6d   :  { %801 = vmatpush1.msra.mxu0 %v1947_v47  ;;  %901 = vmatpush1.msra.mxu1 %v900_v23  ;;  %v953_v23 = vsub.f32 %v1993_v3, %v952_v32  ;;  %v942_v21 = vand.u32 4294901760, %v941_v58 }
  0x6e   :  { %803 = vmatprep.subr.mxu0 %v1955_v53  ;;  %907 = vmatprep.subr.mxu1 %v906_v25  ;;  %v959_v25 = vsub.f32 %v1997_v52, %v958_v42 }
  0x6f   :  { %805 = vmatpush1.msra.mxu0 %v1966_v24  ;;  %913 = vmatpush1.msra.mxu1 %v912_v19  ;;  %v948_v19 = vand.u32 4294901760, %v947_v13  ;;  %v954_v33 = vand.u32 4294901760, %v953_v23 }
  0x70   :  { %838 = vmatprep.mubr.f32.mxu0 %v1554_v0  ;;  %919 = vmatprep.subr.mxu1 %v918_v37  ;;  %v960_v37 = vand.u32 4294901760, %v959_v25 }
  0x71   :  { %1020 = vmatprep.subr.mxu0 %v1859_v4  ;;  %844 = vmatmul.mubr.f32.vlgmr.msra.gmra.mxu0 %v1773_v15 }
  0x72   :  { %925 = vmatpush1.msra.mxu1 %v924_v50  ;;  %1023 = vmatpush1.msra.mxu0 %v1865_v5 }
  0x73   :  { %931 = vmatprep.subr.mxu1 %v930_v60  ;;  %1026 = vmatprep.subr.mxu0 %v1875_v63  ;;  %v85_v63 = vld [vmem:[#allocation7] sm:$0xf] }
  0x74   :  { %937 = vmatpush1.msra.mxu1 %v936_v62  ;;  %1029 = vmatpush1.msra.mxu0 %v1881_v10 }
  0x75   :  { %943 = vmatprep.subr.mxu1 %v942_v21  ;;  %1032 = vmatprep.subr.mxu0 %v1892_v14 }
  0x76   :  { %949 = vmatpush1.msra.mxu1 %v948_v19  ;;  %1035 = vmatpush1.msra.mxu0 %v1898_v12 }
  0x77   :  { %955 = vmatprep.subr.mxu1 %v954_v33  ;;  %1038 = vmatprep.subr.mxu0 %v1909_v56 }
  0x78   :  { %961 = vmatpush1.msra.mxu1 %v960_v37  ;;  %994 = vmatprep.mubr.f32.mxu1 %v1554_v0 }
  0x79   :  { %1041 = vmatpush1.msra.mxu0 %v1914_v28  ;;  %996 = vmatmul.mubr.f32.vlgmr.msra.gmra.mxu1 %v1710_v7 }
  0x7a   :  { %1044 = vmatprep.subr.mxu0 %v1926_v1  ;;  %1124 = vmatprep.subr.mxu1 %v1836_v30 }
  0x7b   :  { %1047 = vmatpush1.msra.mxu0 %v1931_v8  ;;  %1126 = vmatpush1.msra.mxu1 %v1841_v34 }
  0x7c   :  { %1050 = vmatprep.subr.mxu0 %v1959_v54  ;;  %1128 = vmatprep.subr.mxu1 %v1846_v36 }
  0x7d   :  { %1053 = vmatpush1.msra.mxu0 %v1945_v38  ;;  %1130 = vmatpush1.msra.mxu1 %v1851_v41 }
  0x7e   :  { %1056 = vmatprep.subr.mxu0 %v1975_v35  ;;  %1132 = vmatprep.subr.mxu1 %v1856_v46 }
  0x7f   :  { %1059 = vmatpush1.msra.mxu0 %v1980_v45  ;;  %1134 = vmatpush1.msra.mxu1 %v1867_v55 }
  0x80   :  { %1062 = vmatprep.subr.mxu0 %v1993_v3  ;;  %1136 = vmatprep.subr.mxu1 %v1872_v6 }
  0x81   :  { %1065 = vmatpush1.msra.mxu0 %v1997_v52  ;;  %1098 = vmatprep.mubr.f32.mxu0 %v1554_v0 }
  0x82   :  { %1138 = vmatpush1.msra.mxu1 %v1883_v2  ;;  %1101 = vmatmul.mubr.f32.vlgmr.msra.gmra.mxu0 %v1730_v39  ;;  %v2137_v39 = vand.u32 4294901760, %v1975_v35 }
  0x83   :  { %1140 = vmatprep.subr.mxu1 %v1888_v11  ;;  %1216 = vmatprep.subr.mxu0 %v868_v9 }
  0x84   :  { %1142 = vmatpush1.msra.mxu1 %v1900_v22  ;;  %1220 = vmatpush1.msra.mxu0 %v874_v16 }
  0x85   :  { %1144 = vmatprep.subr.mxu1 %v1916_v57  ;;  %1224 = vmatprep.subr.mxu0 %v880_v43 }
  0x86   :  { %1146 = vmatpush1.msra.mxu1 %v1906_v44  ;;  %1228 = vmatpush1.msra.mxu0 %v886_v17 }
  0x87   :  { %1148 = vmatprep.subr.mxu1 %v1936_v20  ;;  %1232 = vmatprep.subr.mxu0 %v892_v18 }
  0x88   :  { %1150 = vmatpush1.msra.mxu1 %v1947_v47  ;;  %1236 = vmatpush1.msra.mxu0 %v898_v29 }
  0x89   :  { %1152 = vmatprep.subr.mxu1 %v1955_v53  ;;  %1240 = vmatprep.subr.mxu0 %v904_v48 }
  0x8a   :  { %1154 = vmatpush1.msra.mxu1 %v1966_v24  ;;  %1187 = vmatprep.mubr.f32.mxu1 %v1554_v0 }
  0x8b   :  { %1244 = vmatpush1.msra.mxu0 %v910_v27  ;;  %1191 = vmatmul.mubr.f32.vlgmr.msra.gmra.mxu1 %v1744_v51  ;;  %v1555_v27 = vmov 1966171168  }
  0x8c   :  { %1248 = vmatprep.subr.mxu0 %v916_v26  ;;  %1334 = vmatprep.subr.mxu1 %v1836_v30  ;;  %v1412_v54 = vunpack.c.l.s4 %v1555_v27 }
  0x8d   :  { %1252 = vmatpush1.msra.mxu0 %v922_v49  ;;  %1336 = vmatpush1.msra.mxu1 %v1841_v34  ;;  %v87_v34 = vlaneseq }
  0x8e   :  { %1256 = vmatprep.subr.mxu0 %v928_v59  ;;  %1338 = vmatprep.subr.mxu1 %v1846_v36 }
  0x8f   :  { %1260 = vmatpush1.msra.mxu0 %v934_v61  ;;  %1340 = vmatpush1.msra.mxu1 %v1851_v41  ;;  %v88_v4 = vshrl.u32 %v87_v34, 7  ;;  %vm1436_vm1 = vcmp.lt.s32.totalorder %v87_v34, 512 }
  0x90   :  { %1264 = vmatprep.subr.mxu0 %v2137_v39  ;;  %1342 = vmatprep.subr.mxu1 %v1856_v46 }
  0x91   :  { %1268 = vmatpush1.msra.mxu0 %v946_v31  ;;  %1344 = vmatpush1.msra.mxu1 %v1867_v55  ;;  %v101_v12 = vsub.s32 3, %v88_v4  ;;  %v1413_v31 = vunpack.c.0.s8 %v1412_v54 }
  0x92   :  { %1272 = vmatprep.subr.mxu0 %v952_v32  ;;  %1346 = vmatprep.subr.mxu1 %v1872_v6  ;;  %v93_v6 = vsub.s32 1, %v88_v4 }
  0x93   :  { %1276 = vmatpush1.msra.mxu0 %v958_v42  ;;  %1309 = vmatprep.mubr.f32.mxu0 %v1554_v0  ;;  %v1416_v33 = vsub.s32 %v1413_v31, %v88_v4 }
  0x94   :  { %1348 = vmatpush1.msra.mxu1 %v1883_v2  ;;  %1311 = vmatmul.mubr.f32.vlgmr.msra.gmra.mxu0 %v1710_v7  ;;  %v94_v14 = vrot.slane %v85_v63, %v93_v6 }
  0x95   :  { %1350 = vmatprep.subr.mxu1 %v1888_v11  ;;  %1397 = vmatprep.mubr.f32.mxu1 %v1554_v0  ;;  %v89_v11 = vsub.s32 0, %v88_v4 }
  0x96   :  { %1352 = vmatpush1.msra.mxu1 %v1900_v22 }
  0x97   :  { %1354 = vmatprep.subr.mxu1 %v1916_v57  ;;  %v90_v16 = vrot.slane %v85_v63, %v89_v11  ;;  %v102_v57 = vrot.slane %v85_v63, %v101_v12 }
  0x98   :  { %1356 = vmatpush1.msra.mxu1 %v1906_v44 }
  0x99   :  { %1358 = vmatprep.subr.mxu1 %v1936_v20 }
  0x9a   :  { %1360 = vmatpush1.msra.mxu1 %v1947_v47 }
  0x9b   :  { %1362 = vmatprep.subr.mxu1 %v1955_v53 }
  0x9c   :  { %1364 = vmatpush1.msra.mxu1 %v1966_v24 }
  0x9d   :  { %1399 = vmatmul.mubr.f32.vlgmr.msra.gmra.mxu1 %v1710_v7  ;;  %v97_v7 = vsub.s32 2, %v88_v4 }
  0x9f   :  { %v98_v28 = vrot.slane %v85_v63, %v97_v7 }
  0xfd   :  { %v198_v51 = vpop.f32.mrf.mxu0 }
  0xfe   :  { %v199_v18 = vadd.f32 %v198_v51, %v90_v16 }
  0xff   :  { %v200_v15 = vpop.f32.mrf.mxu0 }
 0x100   :  { %v201_v56 = vadd.f32 %v200_v15, %v94_v14 }
 0x103   :  { %v350_v30 = vpop.f32.mrf.mxu1 }
 0x104   :  { %v351_v48 = vadd.f32 %v350_v30, %v199_v18 }
 0x105   :  { %v352_v36 = vpop.f32.mrf.mxu1 }
 0x106   :  { %v353_v8 = vadd.f32 %v352_v36, %v201_v56 }
 0x10d   :  { %v455_v0 = vpop.f32.mrf.mxu0 }
 0x10e   :  { %v456_v26 = vadd.f32 %v455_v0, %v351_v48 }
 0x10f   :  { %v457_v41 = vpop.f32.mrf.mxu0 }
 0x110   :  { %v458_v53 = vadd.f32 %v457_v41, %v353_v8 }
 0x115   :  { %v545_v46 = vpop.f32.mrf.mxu1 }
 0x116   :  { %v546_v3 = vadd.f32 %v545_v46, %v456_v26 }
 0x117   :  { %v547_v55 = vpop.f32.mrf.mxu1 }
 0x118   :  { %v548_v35 = vadd.f32 %v547_v55, %v458_v53 }
 0x11e   :  { %v665_v5 = vpop.f32.mrf.mxu0 }
 0x11f   :  { %v666_v40 = vadd.f32 %v665_v5, %v546_v3 }
 0x120   :  { %v667_v10 = vpop.f32.mrf.mxu0 }
 0x121   :  { %v668_v52 = vadd.f32 %v667_v10, %v548_v35 }
 0x127   :  { %v753_v2 = vpop.f32.mrf.mxu1 }
 0x128   :  { %v754_v60 = vadd.f32 %v753_v2, %v666_v40 }
 0x129   :  { %v755_v22 = vpop.f32.mrf.mxu1 }
 0x12a   :  { %v756_v42 = vadd.f32 %v755_v22, %v668_v52 }
 0x12c   :  { %v1409_v19 = vcombine.low %v754_v60, %v756_v42 }
 0x12e   :  { %v1417_v15 = vrot.slane %v1409_v19, %v1416_v33 }
 0x131   :  { %v845_v9 = vpop.f32.mrf.mxu0 }
 0x132   :  { %v846_v20 = vadd.f32 %v845_v9, %v98_v28 }
 0x133   :  { %v847_v43 = vpop.f32.mrf.mxu0 }
 0x134   :  { %v848_v29 = vadd.f32 %v847_v43, %v102_v57 }
 0x139   :  { %v997_v44 = vpop.f32.mrf.mxu1 }
 0x13a   :  { %v998_v45 = vadd.f32 %v997_v44, %v846_v20 }
 0x13b   :  { %v999_v1 = vpop.f32.mrf.mxu1 }
 0x13c   :  { %v1000_v49 = vadd.f32 %v999_v1, %v848_v29 }
 0x142   :  { %v1102_v17 = vpop.f32.mrf.mxu0 }
 0x143   :  { %v1103_v61 = vadd.f32 %v1102_v17, %v998_v45 }
 0x144   :  { %v1104_v38 = vpop.f32.mrf.mxu0 }
 0x145   :  { %v1105_v62 = vadd.f32 %v1104_v38, %v1000_v49 }
 0x14b   :  { %v1192_v47 = vpop.f32.mrf.mxu1 }
 0x14c   :  { %v1193_v58 = vadd.f32 %v1192_v47, %v1103_v61 }
 0x14d   :  { %v1194_v59 = vpop.f32.mrf.mxu1 }
 0x14e   :  { %v1195_v50 = vadd.f32 %v1194_v59, %v1105_v62 }
 0x154   :  { %v1312_v24 = vpop.f32.mrf.mxu0 }
 0x155   :  { %v1313_v23 = vadd.f32 %v1312_v24, %v1193_v58 }
 0x156   :  { %v1314_v32 = vpop.f32.mrf.mxu0 }
 0x157   :  { %v1315_v25 = vadd.f32 %v1314_v32, %v1195_v50 }
 0x15d   :  { %v1400_v13 = vpop.f32.mrf.mxu1 }
 0x15e   :  { %v1401_v37 = vadd.f32 %v1400_v13, %v1313_v23 }
 0x15f   :  { %v1402_v21 = vpop.f32.mrf.mxu1 }
 0x160   :  { %v1403_v39 = vadd.f32 %v1402_v21, %v1315_v25 }
 0x162   :  { %v1410_v51 = vcombine.low %v1401_v37, %v1403_v39 }
 0x164   :  { %v1424_v30 = vrot.slane %v1410_v51, %v1416_v33 }
 0x166   :  { %v1425_v0 = vcombine.low %v1417_v15, %v1424_v30 }
 0x168   :  { %v1432_v36 = vrot.slane %v1425_v0, %v1416_v33 }
 0x16a   :  { %1438 = vst.msk [vmem:[#allocation8] sm:$0xf] %vm1436_vm1, %v1432_v36 }
 0x16b   :  { %1534 = shalt.err (!%p1531_p5)
}
 0x16c   :  { %1448 = dma.vmem_to_hbm [thread:$0]  %s1446_s2, 64, %s2135_s3, [#allocation4]  }
 0x16d   :  { %1547 = dma.done.wait [#allocation4], 64  }
 0x16e   :  { %1548 = vsyncadd [#allocation4], 4294967232 }
 0x16f   :  { %1452 = vsyncpa [#allocation3], 1 }
 0x170   :  { %1453 = vsyncpa [#allocation6], 1 }
 0x171   :  { %1454 = vsyncpa [#allocation4], 1 }

</bundles_post_ra>
